<compile_context>
chip_gen: v5e
topology: v5e:2x2
jax: 0.10.0
libtpu: 0.0.40
codegen_flags: <defaults>
</compile_context>

<pallas_src>
import jax
import jax.numpy as jnp
from jax.experimental import pallas as pl
from jax.experimental.pallas import tpu as pltpu

SUBLANE = 8  # f32 sublane granule; batch rows are rounded up to this


def _round_up(x: int, m: int) -> int:
    return ((x + m - 1) // m) * m


def _pick_tile_b(batch_pad: int) -> int:
    """Largest power-of-two row tile (8..1024) that divides the 8-rounded batch.

    When the batch is big enough, cap the tile so the grid has >= 2 steps and the
    'parallel' batch axis can shard across v7x's two TensorCores."""
    tile = 8
    for t in (1024, 512, 256, 128, 64, 32, 16, 8):
        if batch_pad % t == 0:
            tile = t
            break
    if batch_pad // tile < 2 and batch_pad >= 512:
        for t in (512, 256, 128, 64, 32, 16, 8):
            if t < tile and batch_pad % t == 0:
                tile = t
                break
    return tile


def _const_spec(shape):
    """BlockSpec for a grid-invariant (weight/bias) operand.

    Single-buffered when the installed jax supports pipeline_mode; the block index
    never changes, so extra pipeline buffers are pure VMEM waste."""
    try:
        return pl.BlockSpec(shape, lambda i: (0, 0), pipeline_mode=pl.Buffered(1))
    except Exception:  # older jax without pipeline_mode / Buffered
        return pl.BlockSpec(shape, lambda i: (0, 0))


# ----------------------------------------------------------------------------
# Lightweight "function node" specs (mirror FunctionNode input/output dims).
# ----------------------------------------------------------------------------
class AffineNodeSpec:
    """y = x @ W + b  (Linear-style FunctionNode)."""

    def __init__(self, input_dim: int, output_dim: int, key):
        self.input_dim = input_dim
        self.output_dim = output_dim
        kw, kb = jax.random.split(key)
        scale = 1.0 / jnp.sqrt(jnp.float32(input_dim))
        self.w = jax.random.normal(kw, (input_dim, output_dim), jnp.float32) * scale
        self.b = jax.random.normal(kb, (1, output_dim), jnp.float32) * 0.1
        self.kind = "affine"


class TanhNodeSpec:
    """y = tanh(x)  (elementwise FunctionNode, preserves dim)."""

    def __init__(self, input_dim: int):
        self.input_dim = input_dim
        self.output_dim = input_dim
        self.kind = "tanh"


class SequentialWrapperNode:
    """JAX/Pallas port of SequentialWrapperNode: validates the chain and runs the
    fused sequential forward pass in a single batch-tiled Pallas kernel."""

    def __init__(self, function_nodes, input_dim=None):
        if input_dim is not None and input_dim != function_nodes[0].input_dim:
            raise ValueError(
                "Provided input_dim does not match the input_dim of the first "
                "function node."
            )
        for i in range(1, len(function_nodes)):
            if function_nodes[i].input_dim != function_nodes[i - 1].output_dim:
                raise ValueError(
                    f"Dimension mismatch at index {i} in SequentialWrapperNode"
                )
        self.function_nodes = list(function_nodes)
        self.input_dim = function_nodes[0].input_dim
        self.output_dim = function_nodes[-1].output_dim
        self._kinds = tuple(n.kind for n in function_nodes)

        # bf16 elementwise (bias add / tanh) only on chips with a bf16 VPU/EUP
        # (v6e and newer); v5e and older keep the f32 elementwise path.
        dev_kind = jax.devices()[0].device_kind.lower()
        old_chip = any(t in dev_kind for t in ("v2", "v3", "v4", "v5"))
        self._act_dtype = jnp.float32 if old_chip else jnp.bfloat16

        # Weights are bf16 MXU operands (f32 accumulation in the dot);
        # biases live in the activation dtype.  Built once, reused every call.
        self._params = []
        for n in function_nodes:
            if n.kind == "affine":
                self._params.append(n.w.astype(jnp.bfloat16))
                self._params.append(n.b.astype(self._act_dtype))

    # ------------------------------------------------------------------
    # Fused Pallas kernel for the whole sequential chain.
    # ------------------------------------------------------------------
    def __call__(self, x: jax.Array) -> jax.Array:
        batch = x.shape[0]
        batch_pad = _round_up(batch, SUBLANE)
        tile_b = _pick_tile_b(batch_pad)

        # Stream the input as bf16 (the MXU operand dtype) with NO feature
        # padding; only a cheap row pad up to the sublane granule.
        x_in = x.astype(jnp.bfloat16)
        if batch_pad != batch:
            x_in = jnp.pad(x_in, ((0, batch_pad - batch), (0, 0)))

        kinds = self._kinds
        act_dtype = self._act_dtype

        def seq_kernel(x_ref, *refs):
            out_ref = refs[-1]
            param_refs = refs[:-1]
            h = x_ref[...]                        # bf16 activation tile
            p = 0
            # Static Python loop over the node chain -> fully fused in-kernel.
            for node_kind in kinds:
                if node_kind == "affine":
                    w = param_refs[p][...]        # bf16 weights, VMEM-resident
                    b = param_refs[p + 1][...]    # bias in activation dtype
                    p += 2
                    acc = jnp.dot(
                        h.astype(jnp.bfloat16), w,
                        preferred_element_type=jnp.float32,  # f32 MXU accumulation
                    )
                    h = acc.astype(act_dtype) + b
                elif node_kind == "tanh":
                    h = jnp.tanh(h.astype(act_dtype))        # EUP transcendental
                else:
                    raise NotImplementedError(node_kind)
            out_ref[...] = h.astype(out_ref.dtype)

        grid = (batch_pad // tile_b,)

        # Activation tiles stream over the batch grid; parameters use a constant
        # index_map (single-buffered) and stay resident in VMEM across all steps.
        in_specs = [pl.BlockSpec((tile_b, self.input_dim), lambda i: (i, 0))]
        for p_arr in self._params:
            in_specs.append(_const_spec(p_arr.shape))
        out_spec = pl.BlockSpec((tile_b, self.output_dim), lambda i: (i, 0))

        # Advisory cost estimate for XLA scheduling around the custom call.
        flops, trans = 0, 0
        for n in self.function_nodes:
            if n.kind == "affine":
                flops += 2 * batch_pad * n.input_dim * n.output_dim
            elif n.kind == "tanh":
                trans += batch_pad * n.input_dim
        bytes_accessed = (
            x_in.size * x_in.dtype.itemsize
            + sum(w.size * w.dtype.itemsize for w in self._params)
            + batch_pad * self.output_dim * 4
        )
        cost = pl.CostEstimate(
            flops=int(flops),
            transcendentals=int(trans),
            bytes_accessed=int(bytes_accessed),
        )

        out = pl.pallas_call(
            seq_kernel,
            out_shape=jax.ShapeDtypeStruct((batch_pad, self.output_dim), jnp.float32),
            grid=grid,
            in_specs=in_specs,
            out_specs=out_spec,
            compiler_params=pltpu.CompilerParams(
                dimension_semantics=("parallel",),  # megacore split on v7x
            ),
            cost_estimate=cost,
        )(x_in, *self._params)

        return out[:batch] if batch_pad != batch else out

    # Pure-JAX reference replicating the same dtype chain (bf16 MXU operands,
    # f32 accumulation, chip-gated elementwise dtype) for checking.
    def reference(self, x: jax.Array) -> jax.Array:
        h = x.astype(jnp.bfloat16)
        for node in self.function_nodes:
            if node.kind == "affine":
                acc = jnp.dot(
                    h.astype(jnp.bfloat16),
                    node.w.astype(jnp.bfloat16),
                    preferred_element_type=jnp.float32,
                )
                h = acc.astype(self._act_dtype) + node.b.astype(self._act_dtype)
            elif node.kind == "tanh":
                h = jnp.tanh(h.astype(self._act_dtype))
        return h.astype(jnp.float32)


if __name__ == "__main__":
    key = jax.random.PRNGKey(0)
    k_in, k_n1, k_n3 = jax.random.split(key, 3)

    batch = 8
    d0, d1, d2 = 32, 64, 32

    # Sequential chain: affine(32->64) -> tanh -> affine(64->32)
    nodes = [
        AffineNodeSpec(d0, d1, k_n1),
        TanhNodeSpec(d1),
        AffineNodeSpec(d1, d2, k_n3),
    ]
    seq = SequentialWrapperNode(nodes, input_dim=d0)

    x = jax.random.normal(k_in, (batch, d0), jnp.float32)

    y = jax.block_until_ready(seq(x))
    y_ref = seq.reference(x)

    assert y.shape == (batch, d2)
    assert jnp.allclose(y, y_ref, atol=2e-2, rtol=2e-2), "mismatch vs reference"

    print("KERNEL_OK")
</pallas_src>

<mosaic_0001>
module attributes {stable_mosaic.version = 11 : i64} {
  func.func @seq_kernel(%arg0: i32, %arg1: memref<8x32xbf16, #tpu.memory_space<vmem>>, %arg2: memref<32x64xbf16, #tpu.memory_space<vmem>>, %arg3: memref<1x64xbf16, #tpu.memory_space<vmem>>, %arg4: memref<64x32xbf16, #tpu.memory_space<vmem>>, %arg5: memref<1x32xbf16, #tpu.memory_space<vmem>>, %arg6: memref<8x32xf32, #tpu.memory_space<vmem>>) attributes {dimension_semantics = [#tpu.dimension_semantics<parallel>], iteration_bounds = array<i64: 1>, scalar_prefetch = 0 : i64, scratch_operands = 0 : i64, tpu.core_type = #tpu.core_type<tc>, window_params = [{transform_indices = @transform_0, window_bounds = array<i64: 8, 32>}, {pipeline_mode = #tpu.pipeline_mode<synchronous>, transform_indices = @transform_1, window_bounds = array<i64: 32, 64>}, {pipeline_mode = #tpu.pipeline_mode<synchronous>, transform_indices = @transform_2, window_bounds = array<i64: 1, 64>}, {pipeline_mode = #tpu.pipeline_mode<synchronous>, transform_indices = @transform_3, window_bounds = array<i64: 64, 32>}, {pipeline_mode = #tpu.pipeline_mode<synchronous>, transform_indices = @transform_4, window_bounds = array<i64: 1, 32>}, {transform_indices = @transform_5, window_bounds = array<i64: 8, 32>}]} {
    %c0 = arith.constant 0 : index
    %c0_0 = arith.constant 0 : index
    %0 = vector.load %arg1[%c0, %c0_0] : memref<8x32xbf16, #tpu.memory_space<vmem>>, vector<8x32xbf16>
    %c0_1 = arith.constant 0 : index
    %c0_2 = arith.constant 0 : index
    %1 = vector.load %arg2[%c0_1, %c0_2] : memref<32x64xbf16, #tpu.memory_space<vmem>>, vector<32x64xbf16>
    %c0_3 = arith.constant 0 : index
    %c0_4 = arith.constant 0 : index
    %2 = vector.load %arg3[%c0_3, %c0_4] : memref<1x64xbf16, #tpu.memory_space<vmem>>, vector<1x64xbf16>
    %cst = arith.constant dense<0.000000e+00> : vector<8x64xf32>
    %3 = tpu.matmul %0, %1, %cst {dimension_numbers = #tpu.dot_dimension_numbers<[1], [0], [0], [1], [0, 0, 1, 1], [], []>} : vector<8x32xbf16>, vector<32x64xbf16>, vector<8x64xf32> -> vector<8x64xf32>
    %4 = arith.truncf %3 : vector<8x64xf32> to vector<8x64xbf16>
    %5 = vector.broadcast %2 : vector<1x64xbf16> to vector<8x64xbf16>
    %6 = arith.addf %4, %5 : vector<8x64xbf16>
    %7 = math.tanh %6 : vector<8x64xbf16>
    %c0_5 = arith.constant 0 : index
    %c0_6 = arith.constant 0 : index
    %8 = vector.load %arg4[%c0_5, %c0_6] : memref<64x32xbf16, #tpu.memory_space<vmem>>, vector<64x32xbf16>
    %c0_7 = arith.constant 0 : index
    %c0_8 = arith.constant 0 : index
    %9 = vector.load %arg5[%c0_7, %c0_8] : memref<1x32xbf16, #tpu.memory_space<vmem>>, vector<1x32xbf16>
    %cst_9 = arith.constant dense<0.000000e+00> : vector<8x32xf32>
    %10 = tpu.matmul %7, %8, %cst_9 {dimension_numbers = #tpu.dot_dimension_numbers<[1], [0], [0], [1], [0, 0, 1, 1], [], []>} : vector<8x64xbf16>, vector<64x32xbf16>, vector<8x32xf32> -> vector<8x32xf32>
    %11 = arith.truncf %10 : vector<8x32xf32> to vector<8x32xbf16>
    %12 = vector.broadcast %9 : vector<1x32xbf16> to vector<8x32xbf16>
    %13 = arith.addf %11, %12 : vector<8x32xbf16>
    %14 = arith.extf %13 : vector<8x32xbf16> to vector<8x32xf32>
    %c0_10 = arith.constant 0 : index
    %c0_11 = arith.constant 0 : index
    %15 = vector.load %arg6[%c0_10, %c0_11] : memref<8x32xf32, #tpu.memory_space<vmem>>, vector<8x32xf32>
    tpu.vector_store %arg6[%c0_10, %c0_11], %14 {strides = array<i32>} : memref<8x32xf32, #tpu.memory_space<vmem>>, vector<8x32xf32>,
    return
  }
  func.func @transform_0(%arg0: i32) -> (i32, i32) {
    %c0_i32 = arith.constant 0 : i32
    %c0_i32_0 = arith.constant 0 : i32
    return %arg0, %c0_i32 : i32, i32
  }
  func.func @transform_1(%arg0: i32) -> (i32, i32) {
    %c0_i32 = arith.constant 0 : i32
    %c0_i32_0 = arith.constant 0 : i32
    %c0_i32_1 = arith.constant 0 : i32
    return %c0_i32, %c0_i32_0 : i32, i32
  }
  func.func @transform_2(%arg0: i32) -> (i32, i32) {
    %c0_i32 = arith.constant 0 : i32
    %c0_i32_0 = arith.constant 0 : i32
    %c0_i32_1 = arith.constant 0 : i32
    return %c0_i32, %c0_i32_0 : i32, i32
  }
  func.func @transform_3(%arg0: i32) -> (i32, i32) {
    %c0_i32 = arith.constant 0 : i32
    %c0_i32_0 = arith.constant 0 : i32
    %c0_i32_1 = arith.constant 0 : i32
    return %c0_i32, %c0_i32_0 : i32, i32
  }
  func.func @transform_4(%arg0: i32) -> (i32, i32) {
    %c0_i32 = arith.constant 0 : i32
    %c0_i32_0 = arith.constant 0 : i32
    %c0_i32_1 = arith.constant 0 : i32
    return %c0_i32, %c0_i32_0 : i32, i32
  }
  func.func @transform_5(%arg0: i32) -> (i32, i32) {
    %c0_i32 = arith.constant 0 : i32
    %c0_i32_0 = arith.constant 0 : i32
    return %arg0, %c0_i32 : i32, i32
  }
}

</mosaic_0001>

<bundles_post_ra>
// kernel: tpu_custom_call.1
= control target key start
LH: loop header
LB: loop body
LE: loop exit
PB: predicated region body
PF: predicated region fallthrough
CT: control target
= control target key end

     0   :  { %s270_s0 = inlined_call_operand.vmem [shape: bf16[8,32], index: 0, kind: input, shape index: {}]   ;;  %s271_s1 = inlined_call_operand.vmem [shape: bf16[32,64], index: 1, kind: input, shape index: {}]   ;;  %s272_s2 = inlined_call_operand.vmem [shape: bf16[1,64], index: 2, kind: input, shape index: {}]   ;;  %s273_s3 = inlined_call_operand.vmem [shape: bf16[64,32], index: 3, kind: input, shape index: {}]   ;;  %s274_s4 = inlined_call_operand.vmem [shape: bf16[1,32], index: 4, kind: input, shape index: {}]   ;;  %s275_s5 = inlined_call_operand.hbm [shape: f32[8,32], index: 5, kind: output, shape index: {}]  }
   0x1   :  { %v173_v0 = vld [vmem:[%s271_s1 + $0x8] sm:$0xff] }
   0x2   :  { %10 = vsyncpa [#allocation3], 0  ;;  %50 = vmatpush.bf16.msra.mxu0 %v173_v0  ;;  %v172_v1 = vld [vmem:[%s271_s1] sm:$0xff]  ;;  %vm40_vm0 = vcmask 261120   ;;  %v177_v3 = vld [vmem:[%s273_s3 + $0x18] sm:$0xff]  ;;  %vm102_vm1 = vcmask 523264  }
   0x3   :  { %v22_v2 = vld [vmem:[%s270_s0] sm:$0xf]  ;;  %110 = vmatpush.bf16.msra.mxu1 %v177_v3  ;;  %v176_v4 = vld [vmem:[%s273_s3 + $0x10] sm:$0xff]  ;;  %v175_v5 = vld [vmem:[%s273_s3 + $0x8] sm:$0xff]  ;;  %s137_s11 = sshll.u32 %s275_s5, 4  ;;  %s138_s11 = int_to_ptr.hbm [resolvable:$true] %s137_s11 }
   0x4   :  { %v174_v6 = vld [vmem:[%s273_s3] sm:$0xff] }
   0x5   :  { %v27_v7 = vld [vmem:[%s272_s2] sm:$0x1]  ;;  %s207_s2 = smov [#allocation2]  }
   0x6   :  { %51 = vmatpush.bf16.msra.mxu0 %v172_v1  ;;  %v59_v8 = vpack.i.b16 %v27_v7, %v27_v7  ;;  %v77_v20 = vld [vmem:[%s274_s4] sm:$0x1]  ;;  %s135_s8 = sshll.u32 %s207_s2, 4  ;;  %s136_s8 = int_to_ptr.vmem [resolvable:$true] %s135_s8 }
   0x7   :  { %111 = vmatpush.bf16.msra.mxu1 %v176_v4  ;;  %v121_v21 = vpack.i.b16 %v77_v20, %v77_v20 }
   0x8   :  { %v61_v9 = vperm.slane %v59_v8, 0 }
   0x9   :  { %154 = vmatmul.msk.bf16.vlgmr.msra.gmra.mxu0 %vm40_vm0, %v22_v2  ;;  %v123_v22 = vperm.slane %v121_v21, 0 }
   0xa   :  { %v63_v12 = vunpack.c.l.bf16 %v61_v9 }
   0xb   :  { %112 = vmatpush.bf16.msra.mxu1 %v175_v5  ;;  %v125_v25 = vunpack.c.l.bf16 %v123_v22 }
   0xf   :  { %113 = vmatpush.bf16.msra.mxu1 %v174_v6 }
  0x86   :  { %v53_v10 = vpop.f32.mrf.mxu0 }
  0x87   :  { %v57_v11 = vpack.c.bf16 %v53_v10, %v53_v10 }
  0x89   :  { %v62_v13 = vunpack.c.l.bf16 %v57_v11 }
  0x8b   :  { %v64_v14 = vadd.f32 %v63_v12, %v62_v13 }
  0x8d   :  { %v65_v15 = vpack.c.bf16 %v64_v14, %v64_v14 }
  0x8e   :  { %v55_v16 = vpop.f32.mrf.mxu0 }
  0x8f   :  { %v66_v17 = vunpack.c.l.bf16 %v65_v15 }
  0x91   :  { %179 = vtanh.f32 %v66_v17 }
  0x97   :  { %v180_v18 = vpop.eup %179 }
  0x98   :  { %v68_v19 = vpack.c.bf16 %v180_v18, %v180_v18 }
  0x9a   :  { %171 = vmatmul.msk.bf16.vlgmr.msra.gmra.mxu1 %vm102_vm1, %v68_v19 }
 0x117   :  { %v115_v23 = vpop.f32.mrf.mxu1 }
 0x118   :  { %v119_v24 = vpack.c.bf16 %v115_v23, %v115_v23 }
 0x11a   :  { %v124_v26 = vunpack.c.l.bf16 %v119_v24 }
 0x11c   :  { %v126_v27 = vadd.f32 %v125_v25, %v124_v26 }
 0x11e   :  { %v127_v28 = vpack.c.bf16 %v126_v27, %v126_v27 }
 0x11f   :  { %v117_v29 = vpop.f32.mrf.mxu1 }
 0x120   :  { %v128_v30 = vunpack.c.l.bf16 %v127_v28 }
 0x122   :  { %129 = vst.msk [vmem:[#allocation2] sm:$0xff] %vm40_vm0, %v128_v30 }
 0x123   :  { %140 = dma.vmem_to_hbm [thread:$0]  %s136_s8, 128, %s138_s11, [#allocation3]  }
 0x124   :  { %205 = dma.done.wait [#allocation3], 128  }
 0x125   :  { %206 = vsyncadd [#allocation3], 4294967168 }
 0x126   :  { %145 = vsyncpa [#allocation3], 1 }

</bundles_post_ra>
